<compile_context>
chip_gen: v7x
topology: tpu7x:2x2x1
jax: 0.10.0
libtpu: 0.0.40
codegen_flags: <defaults>
</compile_context>

<pallas_src>
import math
import functools

import jax
import jax.numpy as jnp
from jax import lax
from jax.experimental import pallas as pl
from jax.experimental.pallas import tpu as pltpu


def _round_up(v, m):
    return (v + m - 1) // m * m


def aamsoftmax_kernel(x_ref, wt_ref, label_ref, tgt_ref, out_ref,
                      m_sc, l_sc,
                      *, cos_m, sin_m, th, mm, s, n_class, class_tile):
    ci = pl.program_id(1)
    nc = pl.num_programs(1)

    # ---- first class tile of this batch tile: reset the online-softmax state
    @pl.when(ci == 0)
    def _():
        m_sc[...] = jnp.full_like(m_sc, -1e30)
        l_sc[...] = jnp.zeros_like(l_sc)

    # ---- cosine similarities for this class tile: bf16 operands, f32 accumulation.
    # x_ref (TB, E_pad) bf16, wt_ref (E_pad, TC) bf16 -> (TB, TC) f32 on the MXU.
    cosine = lax.dot_general(
        x_ref[...], wt_ref[...],
        dimension_numbers=(((1,), (0,)), ((), ())),
        preferred_element_type=jnp.float32)

    # ---- mask out the target column and padded classes (row-shaped iota, broadcast)
    label = label_ref[...]                                                 # (TB, 1) i32
    classes = ci * class_tile + lax.broadcasted_iota(jnp.int32, (1, class_tile), 1)
    mask = jnp.logical_or(classes == label, classes >= n_class)            # (TB, TC)
    logits = jnp.where(mask, jnp.float32(-1e30), cosine * s)

    # ---- online softmax update over the (non-target) class stream
    m_prev = m_sc[...]
    m_new = jnp.maximum(m_prev, jnp.max(logits, axis=1, keepdims=True))
    l_sc[...] = l_sc[...] * jnp.exp(m_prev - m_new) + jnp.sum(
        jnp.exp(logits - m_new), axis=1, keepdims=True)
    m_sc[...] = m_new

    # ---- finalize: apply the angular margin to the (TB, 1) target cosine only
    @pl.when(ci == nc - 1)
    def _():
        tgt = tgt_ref[...]                                                 # (TB, 1) f32
        sine = jnp.sqrt(jnp.clip(1.0 - tgt * tgt, 0.0, 1.0))
        phi = tgt * cos_m - sine * sin_m
        phi = jnp.where(tgt - th > 0, phi, tgt - mm)
        phi_s = phi * s                                                    # margined target logit

        m_nt = m_sc[...]                                                   # max over non-target logits
        m_all = jnp.maximum(m_nt, phi_s)
        denom = l_sc[...] * jnp.exp(m_nt - m_all) + jnp.exp(phi_s - m_all)
        lse = m_all + jnp.log(denom)                                       # logsumexp over all classes

        out_ref[:, 0:1] = lse - phi_s                                      # per-row CE loss
        # TODO(synk): exact logit ties resolve in favor of the label (matches the reference
        # argmax semantics only up to tie-breaking; ties never occur with float noise).
        out_ref[:, 1:2] = (phi_s >= m_nt).astype(jnp.float32)              # per-row top-1 hit


def aamsoftmax_forward(x, weight, label, *, m, s, class_tile=2048):
    B, E = x.shape
    C, E_w = weight.shape
    assert E_w == E
    assert C >= 2  # TODO(synk): n_class == 1 would leave a class tile with no valid non-target column.

    E_pad = _round_up(E, 128)

    # Batch tiling (16-row alignment keeps bf16 sublane packing happy).
    TB = min(256, _round_up(B, 16))
    B_pad = _round_up(B, TB)
    NB = B_pad // TB
    if NB == 1 and TB >= 32:
        # Give the second TensorCore work on v7x when the batch fits a single tile.
        TB = _round_up(TB // 2, 16)
        B_pad = _round_up(B, TB)
        NB = B_pad // TB

    # Class tiling (reduction axis, kept last in the grid).
    TC = min(_round_up(class_tile, 128), _round_up(C, 128))
    C_pad = _round_up(C, TC)
    NC = C_pad // TC

    cos_m = math.cos(m)
    sin_m = math.sin(m)
    th = math.cos(math.pi - m)
    mm = math.sin(math.pi - m) * m

    # ---- wrapper-side preprocessing (once per call, not per grid step) -------------
    x32 = x.astype(jnp.float32)
    w32 = weight.astype(jnp.float32)
    xn = x32 * lax.rsqrt(jnp.maximum(jnp.sum(x32 * x32, axis=1, keepdims=True), 1e-24))
    wn = w32 * lax.rsqrt(jnp.maximum(jnp.sum(w32 * w32, axis=1, keepdims=True), 1e-24))
    lab = label.astype(jnp.int32)

    # Target-class cosine gathered in f32 (tiny: B rows of E); the kernel never needs
    # to extract the target column from the streamed logits.
    tgt_cos = jnp.sum(xn * wn[lab], axis=1)                                # (B,)

    # Zero-padding: zero embedding columns leave dot products unchanged; padded class
    # columns are masked to -inf in the kernel; padded batch rows are dropped below.
    xn_p = jnp.zeros((B_pad, E_pad), jnp.bfloat16).at[:B, :E].set(xn.astype(jnp.bfloat16))
    wt_p = jnp.zeros((E_pad, C_pad), jnp.bfloat16).at[:E, :C].set(wn.T.astype(jnp.bfloat16))
    lab_p = jnp.full((B_pad, 1), -1, jnp.int32).at[:B, 0].set(lab)
    tgt_p = jnp.zeros((B_pad, 1), jnp.float32).at[:B, 0].set(tgt_cos)

    kernel = functools.partial(
        aamsoftmax_kernel, cos_m=cos_m, sin_m=sin_m, th=th, mm=mm,
        s=float(s), n_class=C, class_tile=TC)

    rows = pl.pallas_call(
        kernel,
        out_shape=jax.ShapeDtypeStruct((B_pad, 2), jnp.float32),
        grid_spec=pltpu.PrefetchScalarGridSpec(
            num_scalar_prefetch=0,
            grid=(NB, NC),
            in_specs=[
                pl.BlockSpec((TB, E_pad), lambda bi, ci: (bi, 0)),   # normalized x (bf16)
                pl.BlockSpec((E_pad, TC), lambda bi, ci: (0, ci)),   # normalized W^T streams over classes
                pl.BlockSpec((TB, 1), lambda bi, ci: (bi, 0)),       # labels
                pl.BlockSpec((TB, 1), lambda bi, ci: (bi, 0)),       # target cosine
            ],
            out_specs=pl.BlockSpec((TB, 2), lambda bi, ci: (bi, 0)), # [loss, top-1 hit] per row
            scratch_shapes=[
                pltpu.VMEM((TB, 1), jnp.float32),                    # running max
                pltpu.VMEM((TB, 1), jnp.float32),                    # running sum-exp
            ]),
        compiler_params=pltpu.CompilerParams(
            dimension_semantics=("parallel", "arbitrary")),
    )(xn_p, wt_p, lab_p, tgt_p)

    loss = jnp.sum(rows[:B, 0]) * (1.0 / B)
    prec1 = jnp.sum(rows[:B, 1]) * (100.0 / B)
    return loss, prec1


if __name__ == "__main__":
    # Module hyper-parameters (small synthetic sizes)
    n_class = 64
    embedding_size = 32
    margin_m = 0.2
    scale_s = 30.0
    batch = 8

    key = jax.random.PRNGKey(0)
    k_x, k_w, k_l = jax.random.split(key, 3)

    # Deterministic param init: xavier_normal_(gain=1) -> std = sqrt(2/(fan_in+fan_out))
    std = math.sqrt(2.0 / (n_class + embedding_size))
    weight = jax.random.normal(k_w, (n_class, embedding_size), dtype=jnp.float32) * std

    x = jax.random.normal(k_x, (batch, embedding_size), dtype=jnp.float32)
    label = jax.random.randint(k_l, (batch,), 0, n_class, dtype=jnp.int32)

    loss, prec1 = aamsoftmax_forward(x, weight, label, m=margin_m, s=scale_s)
    jax.block_until_ready((loss, prec1))

    print("KERNEL_OK")
</pallas_src>

<mosaic_0001>
module attributes {stable_mosaic.version = 11 : i64} {
  func.func @aamsoftmax_kernel(%arg0: i32, %arg1: i32, %arg2: memref<16x128xbf16, #tpu.memory_space<vmem>>, %arg3: memref<128x128xbf16, #tpu.memory_space<vmem>>, %arg4: memref<16x1xi32, #tpu.memory_space<vmem>>, %arg5: memref<16x1xf32, #tpu.memory_space<vmem>>, %arg6: memref<16x2xf32, #tpu.memory_space<vmem>>, %arg7: memref<16x1xf32, #tpu.memory_space<vmem>>, %arg8: memref<16x1xf32, #tpu.memory_space<vmem>>) attributes {dimension_semantics = [#tpu.dimension_semantics<parallel>, #tpu.dimension_semantics<arbitrary>], iteration_bounds = array<i64: 1, 1>, scalar_prefetch = 0 : i64, scratch_operands = 2 : i64, tpu.core_type = #tpu.core_type<tc>, window_params = [{transform_indices = @transform_0, window_bounds = array<i64: 16, 128>}, {transform_indices = @transform_1, window_bounds = array<i64: 128, 128>}, {transform_indices = @transform_2, window_bounds = array<i64: 16, 1>}, {transform_indices = @transform_3, window_bounds = array<i64: 16, 1>}, {transform_indices = @transform_4, window_bounds = array<i64: 16, 2>}]} {
    %c0_i32 = arith.constant 0 : i32
    %0 = arith.cmpi eq, %arg1, %c0_i32 : i32
    %1 = arith.extui %0 : i1 to i32
    %c0_i32_0 = arith.constant 0 : i32
    %2 = arith.cmpi ne, %1, %c0_i32_0 : i32
    scf.if %2 {
      %cst_20 = arith.constant -1.000000e+30 : f32
      %41 = vector.broadcast %cst_20 : f32 to vector<16x1xf32>
      %c0_21 = arith.constant 0 : index
      %c0_22 = arith.constant 0 : index
      %42 = vector.load %arg7[%c0_21, %c0_22] : memref<16x1xf32, #tpu.memory_space<vmem>>, vector<16x1xf32>
      tpu.vector_store %arg7[%c0_21, %c0_22], %41 {strides = array<i32>} : memref<16x1xf32, #tpu.memory_space<vmem>>, vector<16x1xf32>,
      %cst_23 = arith.constant 0.000000e+00 : f32
      %43 = vector.broadcast %cst_23 : f32 to vector<16x1xf32>
      %c0_24 = arith.constant 0 : index
      %c0_25 = arith.constant 0 : index
      %44 = vector.load %arg8[%c0_24, %c0_25] : memref<16x1xf32, #tpu.memory_space<vmem>>, vector<16x1xf32>
      tpu.vector_store %arg8[%c0_24, %c0_25], %43 {strides = array<i32>} : memref<16x1xf32, #tpu.memory_space<vmem>>, vector<16x1xf32>,
    } else {
    }
    %c0 = arith.constant 0 : index
    %c0_1 = arith.constant 0 : index
    %3 = vector.load %arg2[%c0, %c0_1] : memref<16x128xbf16, #tpu.memory_space<vmem>>, vector<16x128xbf16>
    %c0_2 = arith.constant 0 : index
    %c0_3 = arith.constant 0 : index
    %4 = vector.load %arg3[%c0_2, %c0_3] : memref<128x128xbf16, #tpu.memory_space<vmem>>, vector<128x128xbf16>
    %cst = arith.constant dense<0.000000e+00> : vector<16x128xf32>
    %5 = tpu.matmul %3, %4, %cst {dimension_numbers = #tpu.dot_dimension_numbers<[1], [0], [0], [1], [0, 0, 1, 1], [], []>} : vector<16x128xbf16>, vector<128x128xbf16>, vector<16x128xf32> -> vector<16x128xf32>
    %c0_4 = arith.constant 0 : index
    %c0_5 = arith.constant 0 : index
    %6 = vector.load %arg4[%c0_4, %c0_5] : memref<16x1xi32, #tpu.memory_space<vmem>>, vector<16x1xi32>
    %c128_i32 = arith.constant 128 : i32
    %7 = arith.muli %arg1, %c128_i32 : i32
    %8 = tpu.iota {dimensions = array<i32: 1>} : vector<1x128xi32>
    %9 = vector.broadcast %7 : i32 to vector<1x128xi32>
    %10 = arith.addi %9, %8 : vector<1x128xi32>
    %11 = vector.broadcast %10 : vector<1x128xi32> to vector<16x128xi32>
    %12 = vector.broadcast %6 : vector<16x1xi32> to vector<16x128xi32>
    %13 = arith.cmpi eq, %11, %12 : vector<16x128xi32>
    %c64_i32 = arith.constant 64 : i32
    %14 = vector.broadcast %c64_i32 : i32 to vector<1x128xi32>
    %15 = arith.cmpi sge, %10, %14 : vector<1x128xi32>
    %16 = vector.broadcast %15 : vector<1x128xi1> to vector<16x128xi1>
    %17 = arith.ori %13, %16 : vector<16x128xi1>
    %cst_6 = arith.constant 3.000000e+01 : f32
    %18 = vector.broadcast %cst_6 : f32 to vector<16x128xf32>
    %19 = arith.mulf %5, %18 : vector<16x128xf32>
    %cst_7 = arith.constant -1.000000e+30 : f32
    %20 = vector.broadcast %cst_7 : f32 to vector<16x128xf32>
    %21 = arith.select %17, %20, %19 : vector<16x128xi1>, vector<16x128xf32>
    %c0_8 = arith.constant 0 : index
    %c0_9 = arith.constant 0 : index
    %22 = vector.load %arg7[%c0_8, %c0_9] : memref<16x1xf32, #tpu.memory_space<vmem>>, vector<16x1xf32>
    %cst_10 = arith.constant dense<0xFF800000> : vector<16xf32>
    %23 = vector.multi_reduction <maximumf>, %21, %cst_10 [1] : vector<16x128xf32> to vector<16xf32>
    %24 = vector.shape_cast %23 : vector<16xf32> to vector<16x1xf32>
    %25 = arith.maximumf %22, %24 : vector<16x1xf32>
    %c0_11 = arith.constant 0 : index
    %c0_12 = arith.constant 0 : index
    %26 = vector.load %arg8[%c0_11, %c0_12] : memref<16x1xf32, #tpu.memory_space<vmem>>, vector<16x1xf32>
    %27 = arith.subf %22, %25 : vector<16x1xf32>
    %28 = math.exp %27 : vector<16x1xf32>
    %29 = arith.mulf %26, %28 : vector<16x1xf32>
    %30 = vector.broadcast %25 : vector<16x1xf32> to vector<16x128xf32>
    %31 = arith.subf %21, %30 : vector<16x128xf32>
    %32 = math.exp %31 : vector<16x128xf32>
    %cst_13 = arith.constant dense<0.000000e+00> : vector<16xf32>
    %33 = vector.multi_reduction <add>, %32, %cst_13 [1] : vector<16x128xf32> to vector<16xf32>
    %34 = vector.shape_cast %33 : vector<16xf32> to vector<16x1xf32>
    %35 = arith.addf %29, %34 : vector<16x1xf32>
    %c0_14 = arith.constant 0 : index
    %c0_15 = arith.constant 0 : index
    %36 = vector.load %arg8[%c0_14, %c0_15] : memref<16x1xf32, #tpu.memory_space<vmem>>, vector<16x1xf32>
    tpu.vector_store %arg8[%c0_14, %c0_15], %35 {strides = array<i32>} : memref<16x1xf32, #tpu.memory_space<vmem>>, vector<16x1xf32>,
    %c0_16 = arith.constant 0 : index
    %c0_17 = arith.constant 0 : index
    %37 = vector.load %arg7[%c0_16, %c0_17] : memref<16x1xf32, #tpu.memory_space<vmem>>, vector<16x1xf32>
    tpu.vector_store %arg7[%c0_16, %c0_17], %25 {strides = array<i32>} : memref<16x1xf32, #tpu.memory_space<vmem>>, vector<16x1xf32>,
    %c0_i32_18 = arith.constant 0 : i32
    %38 = arith.cmpi eq, %arg1, %c0_i32_18 : i32
    %39 = arith.extui %38 : i1 to i32
    %c0_i32_19 = arith.constant 0 : i32
    %40 = arith.cmpi ne, %39, %c0_i32_19 : i32
    scf.if %40 {
      %c0_20 = arith.constant 0 : index
      %c0_21 = arith.constant 0 : index
      %41 = vector.load %arg5[%c0_20, %c0_21] : memref<16x1xf32, #tpu.memory_space<vmem>>, vector<16x1xf32>
      %42 = arith.mulf %41, %41 : vector<16x1xf32>
      %cst_22 = arith.constant 1.000000e+00 : f32
      %43 = vector.broadcast %cst_22 : f32 to vector<16x1xf32>
      %44 = arith.subf %43, %42 : vector<16x1xf32>
      %cst_23 = arith.constant 0.000000e+00 : f32
      %cst_24 = arith.constant 1.000000e+00 : f32
      %45 = vector.broadcast %cst_23 : f32 to vector<16x1xf32>
      %46 = arith.maximumf %45, %44 : vector<16x1xf32>
      %47 = vector.broadcast %cst_24 : f32 to vector<16x1xf32>
      %48 = arith.minimumf %47, %46 : vector<16x1xf32>
      %49 = math.sqrt %48 : vector<16x1xf32>
      %cst_25 = arith.constant 0.980066597 : f32
      %50 = vector.broadcast %cst_25 : f32 to vector<16x1xf32>
      %51 = arith.mulf %41, %50 : vector<16x1xf32>
      %cst_26 = arith.constant 0.198669329 : f32
      %52 = vector.broadcast %cst_26 : f32 to vector<16x1xf32>
      %53 = arith.mulf %49, %52 : vector<16x1xf32>
      %54 = arith.subf %51, %53 : vector<16x1xf32>
      %cst_27 = arith.constant -0.980066597 : f32
      %55 = vector.broadcast %cst_27 : f32 to vector<16x1xf32>
      %56 = arith.subf %41, %55 : vector<16x1xf32>
      %cst_28 = arith.constant 0.000000e+00 : f32
      %57 = vector.broadcast %cst_28 : f32 to vector<16x1xf32>
      %58 = arith.cmpf ogt, %56, %57 : vector<16x1xf32>
      %cst_29 = arith.constant 0.0397338644 : f32
      %59 = vector.broadcast %cst_29 : f32 to vector<16x1xf32>
      %60 = arith.subf %41, %59 : vector<16x1xf32>
      %61 = arith.select %58, %54, %60 : vector<16x1xi1>, vector<16x1xf32>
      %cst_30 = arith.constant 3.000000e+01 : f32
      %62 = vector.broadcast %cst_30 : f32 to vector<16x1xf32>
      %63 = arith.mulf %61, %62 : vector<16x1xf32>
      %c0_31 = arith.constant 0 : index
      %c0_32 = arith.constant 0 : index
      %64 = vector.load %arg7[%c0_31, %c0_32] : memref<16x1xf32, #tpu.memory_space<vmem>>, vector<16x1xf32>
      %65 = arith.maximumf %64, %63 : vector<16x1xf32>
      %c0_33 = arith.constant 0 : index
      %c0_34 = arith.constant 0 : index
      %66 = vector.load %arg8[%c0_33, %c0_34] : memref<16x1xf32, #tpu.memory_space<vmem>>, vector<16x1xf32>
      %67 = arith.subf %64, %65 : vector<16x1xf32>
      %68 = math.exp %67 : vector<16x1xf32>
      %69 = arith.mulf %66, %68 : vector<16x1xf32>
      %70 = arith.subf %63, %65 : vector<16x1xf32>
      %71 = math.exp %70 : vector<16x1xf32>
      %72 = arith.addf %69, %71 : vector<16x1xf32>
      %73 = math.log %72 : vector<16x1xf32>
      %74 = arith.addf %65, %73 : vector<16x1xf32>
      %75 = arith.subf %74, %63 : vector<16x1xf32>
      %c0_35 = arith.constant 0 : index
      %c0_36 = arith.constant 0 : index
      %76 = vector.load %arg6[%c0_35, %c0_36] : memref<16x2xf32, #tpu.memory_space<vmem>>, vector<16x1xf32>
      tpu.vector_store %arg6[%c0_35, %c0_36], %75 {strides = array<i32>} : memref<16x2xf32, #tpu.memory_space<vmem>>, vector<16x1xf32>,
      %77 = arith.cmpf oge, %63, %64 : vector<16x1xf32>
      %78 = arith.extui %77 : vector<16x1xi1> to vector<16x1xi32>
      %79 = arith.sitofp %78 : vector<16x1xi32> to vector<16x1xf32>
      %c0_37 = arith.constant 0 : index
      %c1 = arith.constant 1 : index
      %80 = vector.load %arg6[%c0_37, %c1] : memref<16x2xf32, #tpu.memory_space<vmem>>, vector<16x1xf32>
      tpu.vector_store %arg6[%c0_37, %c1], %79 {strides = array<i32>} : memref<16x2xf32, #tpu.memory_space<vmem>>, vector<16x1xf32>,
    } else {
    }
    return
  }
  func.func @transform_0(%arg0: i32, %arg1: i32) -> (i32, i32) {
    %c0_i32 = arith.constant 0 : i32
    %c0_i32_0 = arith.constant 0 : i32
    return %arg0, %c0_i32 : i32, i32
  }
  func.func @transform_1(%arg0: i32, %arg1: i32) -> (i32, i32) {
    %c0_i32 = arith.constant 0 : i32
    %c0_i32_0 = arith.constant 0 : i32
    return %c0_i32, %arg1 : i32, i32
  }
  func.func @transform_2(%arg0: i32, %arg1: i32) -> (i32, i32) {
    %c0_i32 = arith.constant 0 : i32
    %c0_i32_0 = arith.constant 0 : i32
    return %arg0, %c0_i32 : i32, i32
  }
  func.func @transform_3(%arg0: i32, %arg1: i32) -> (i32, i32) {
    %c0_i32 = arith.constant 0 : i32
    %c0_i32_0 = arith.constant 0 : i32
    return %arg0, %c0_i32 : i32, i32
  }
  func.func @transform_4(%arg0: i32, %arg1: i32) -> (i32, i32) {
    %c0_i32 = arith.constant 0 : i32
    %c0_i32_0 = arith.constant 0 : i32
    return %arg0, %c0_i32 : i32, i32
  }
}

</mosaic_0001>

<bundles_post_ra>
// kernel: tpu_custom_call.1
= control target key start
LH: loop header
LB: loop body
LE: loop exit
PB: predicated region body
PF: predicated region fallthrough
CT: control target
= control target key end

     0   :  { %9 = vsyncpa [#allocation5], 0  ;;  %s436_s15 = smov [#allocation4]   ;;  %s561_s0 = inlined_call_operand.vmem [shape: bf16[16,128], index: 0, kind: input, shape index: {}]   ;;  %s562_s1 = inlined_call_operand.hbm [shape: bf16[128,128], index: 1, kind: input, shape index: {}]   ;;  %s563_s2 = inlined_call_operand.vmem [shape: s32[16,1], index: 2, kind: input, shape index: {}]   ;;  %s564_s3 = inlined_call_operand.vmem [shape: f32[16,1], index: 3, kind: input, shape index: {}]   ;;  %s565_s4 = inlined_call_operand.vmem [shape: f32[16,2], index: 4, kind: output, shape index: {}]  }
   0x1   :  { %s17_s16 = sshll.u32 %s436_s15, 4  ;;  %s412_s19 = scalar_lea.hbm %s562_s1, 1024  ;;  %s18_s16 = int_to_ptr.vmem [resolvable:$true] %s17_s16 }
   0x2   :  { %p413_p0 = scmp.ne.s32.totalorder %s562_s1, %s412_s19  ;;  %p416_p1 = scmp.lt.u32.totalorder %s412_s19, %s562_s1 }
   0x4   :  { %p418_p2 = pnand %p416_p1, %p413_p0 }
   0x6   :  { %421 = shalt.err (!%p418_p2)
}
   0x7   :  { %s422_s24 = scalar_lea.vmem %s18_s16, 1024  ;;  %p427_p4 = scmp.lt.s32.totalorder %s18_s16, %s18_s16 }
   0x8   :  { %p423_p3 = scmp.ne.s32.totalorder %s18_s16, %s422_s24  ;;  %p428_p5 = scmp.lt.s32.totalorder %s422_s24, %s422_s24 }
   0xa   :  { %p429_p6 = por %p428_p5, %p427_p4 }
   0xc   :  { %p430_p7 = pnand %p429_p6, %p423_p3 }
   0xe   :  { %433 = shalt.err (!%p430_p7)
}
   0xf   :  { %s437_s25 = smov 64   ;;  %s438_s26 = smov 4  }
  0x10   :  { %23 = dma.hbm_to_vmem [thread:$0]  %s562_s1, 1024, %s18_s16, [#allocation5], %s437_s25, %s437_s25, %s438_s26  }
  0x11   :  { %434 = dma.done.wait [#allocation5], 1024  }
  0x12   :  { %435 = vsyncadd [#allocation5], 4294966272  ;;  %v439_v0 = vmov 0.0   ;;  %vm440_vm0 = vmmov 0   ;;  %v441_v1 = vmov 0   ;;  %v379_v2 = vld [vmem:[#allocation4] sm:$0xff]   ;;  %v157_v14 = vlaneseq }
  0x13   :  { %344 = vmatprep.subr.bf16.mxu0 %v439_v0  ;;  %360 = vmatprep.mubr.msk.bf16.mxu0 %vm440_vm0, %v439_v0  ;;  %v380_v3 = vld [vmem:[#allocation4 + $0x8] sm:$0xff]   ;;  %v381_v4 = vld [vmem:[#allocation4 + $0x10] sm:$0xff]   ;;  %v154_v5 = vld [vmem:[%s563_s2] sm:$0xff]  ;;  %vm36_vm1 = vcmask 7168   ;;  %v442_v13 = vmov -1e+30  }
  0x14   :  { %372 = vset.pattern.permute.xlu0 %v441_v1  ;;  %373 = vset.pattern.permute.xlu1 %v441_v1  ;;  %v382_v6 = vld [vmem:[#allocation4 + $0x18] sm:$0xff]   ;;  %v155_v7 = vld [vmem:[%s563_s2 + $0x8] sm:$0xff]  ;;  %v383_v8 = vld [vmem:[#allocation4 + $0x20] sm:$0xff]   ;;  %37 = vst.msk [vmem:[#allocation2] sm:$0xff] %vm36_vm1, %v442_v13  ;;  %v158_v15 = vand.u32 127, %v157_v14  ;;  %vm312_vm15 = vcmask 15368  }
  0x15   :  { %345 = vmatpush3.bf16.msra.mxu0 %v379_v2  ;;  %162 = vperm.xlu0 %372, %v154_v5   ;;  %v384_v9 = vld [vmem:[#allocation4 + $0x28] sm:$0xff]   ;;  %v385_v10 = vld [vmem:[#allocation4 + $0x30] sm:$0xff]   ;;  %v386_v11 = vld [vmem:[#allocation4 + $0x38] sm:$0xff]   ;;  %38 = vst.msk [vmem:[#allocation2 + $0x8] sm:$0xff] %vm36_vm1, %v442_v13 }
  0x16   :  { %346 = vmatprep.subr.bf16.mxu0 %v439_v0  ;;  %v387_v12 = vld [vmem:[%s561_s0] sm:$0xff]   ;;  %39 = vst.msk [vmem:[#allocation3] sm:$0xff] %vm36_vm1, %v439_v0  ;;  %40 = vst.msk [vmem:[#allocation3 + $0x8] sm:$0xff] %vm36_vm1, %v439_v0  ;;  %vm169_vm3 = vcmp.ge.s32.totalorder %v158_v15, 64  ;;  %v227_v34 = vld [vmem:[%s564_s3 + $0x8] sm:$0xff] }
  0x17   :  { %v226_v35 = vld [vmem:[%s564_s3] sm:$0xff]  ;;  %v229_v36 = vmul.f32 %v227_v34, %v227_v34  ;;  %v251_v61 = vmul.f32 0.9800666, %v227_v34  ;;  %v330_v63 = vadd.f32 0.9800666, %v227_v34  ;;  %s443_s3 = smov 1  }
  0x18   :  { %v228_v37 = vmul.f32 %v226_v35, %v226_v35  ;;  %v250_v1 = vmul.f32 0.9800666, %v226_v35 }
  0x19   :  { %347 = vmatpush3.bf16.msra.mxu0 %v380_v3  ;;  %165 = vperm.xlu0 %372, %v155_v7   ;;  %v231_v38 = vsub.f32 1.0, %v229_v36  ;;  %v329_v3 = vadd.f32 0.9800666, %v226_v35  ;;  %vm259_vm11 = vcmp.gt.f32.partialorder %v330_v63, 0.0 }
  0x1a   :  { %348 = vmatprep.subr.bf16.mxu0 %v439_v0  ;;  %v230_v39 = vsub.f32 1.0, %v228_v37 }
  0x1b   :  { %v505_v26 = vld [vmem:[#allocation2] sm:$0xff]  ;;  %v233_v40 = vmax.f32 %v231_v38, 0.0  ;;  %vm258_vm12 = vcmp.gt.f32.partialorder %v329_v3, 0.0 }
  0x1c   :  { %v510_v29 = vld [vmem:[#allocation2 + $0x8] sm:$0xff]  ;;  %v232_v41 = vmax.f32 %v230_v39, 0.0 }
  0x1d   :  { %349 = vmatpush3.bf16.msra.mxu0 %v381_v4  ;;  %v235_v42 = vmin.f32 %v233_v40, 1.0 }
  0x1e   :  { %350 = vmatprep.subr.bf16.mxu0 %v439_v0  ;;  %v234_v43 = vmin.f32 %v232_v41, 1.0 }
  0x1f   :  { %388 = vrsqrt.f32 %v235_v42  ;;  %vm245_vm7 = vcmp.eq.f32.partialorder %v235_v42, inf  ;;  %v248_v54 = vand.u32 2147483648, %v235_v42  ;;  %vm247_vm9 = vcmp.eq.f32.partialorder %v235_v42, 0.0 }
  0x20   :  { %390 = vrsqrt.f32 %v234_v43  ;;  %vm238_vm8 = vcmp.eq.f32.partialorder %v234_v43, inf  ;;  %v241_v56 = vand.u32 2147483648, %v234_v43  ;;  %vm240_vm10 = vcmp.eq.f32.partialorder %v234_v43, 0.0 }
  0x21   :  { %351 = vmatpush3.bf16.msra.mxu0 %v382_v6  ;;  %v332_v6 = vadd.f32 -0.039733864, %v227_v34 }
  0x22   :  { %352 = vmatprep.subr.bf16.mxu0 %v439_v0 }
  0x25   :  { %353 = vmatpush3.bf16.msra.mxu0 %v383_v8  ;;  %v331_v8 = vadd.f32 -0.039733864, %v226_v35 }
  0x26   :  { %354 = vmatprep.subr.bf16.mxu0 %v439_v0 }
  0x29   :  { %355 = vmatpush3.bf16.msra.mxu0 %v384_v9  ;;  %v389_v46 = vpop.eup %388 }
  0x2a   :  { %356 = vmatprep.subr.bf16.mxu0 %v439_v0  ;;  %v391_v48 = vpop.eup %390  ;;  %v244_v51 = vmul.f32 %v389_v46, %v235_v42 }
  0x2b   :  { %v237_v53 = vmul.f32 %v391_v48, %v234_v43 }
  0x2c   :  { %v246_v55 = vsel %vm245_vm7, %v235_v42, %v244_v51 }
  0x2d   :  { %357 = vmatpush3.bf16.msra.mxu0 %v385_v10  ;;  %v239_v57 = vsel %vm238_vm8, %v234_v43, %v237_v53  ;;  %v249_v58 = vsel %vm247_vm9, %v248_v54, %v246_v55 }
  0x2e   :  { %358 = vmatprep.subr.bf16.mxu0 %v439_v0  ;;  %v242_v59 = vsel %vm240_vm10, %v241_v56, %v239_v57  ;;  %v253_v62 = vmul.f32 0.19866933, %v249_v58 }
  0x2f   :  { %v252_v2 = vmul.f32 0.19866933, %v242_v59 }
  0x30   :  { %v255_v5 = vsub.f32 %v251_v61, %v253_v62 }
  0x31   :  { %359 = vmatpush3.bf16.msra.mxu0 %v386_v11  ;;  %v254_v7 = vsub.f32 %v250_v1, %v252_v2 }
  0x32   :  { %v263_v9 = vsel %vm259_vm11, %v255_v5, %v332_v6 }
  0x33   :  { %v262_v10 = vsel %vm258_vm12, %v254_v7, %v331_v8  ;;  %v531_v11 = vmul.f32 30.0, %v263_v9 }
  0x34   :  { %361 = vmatmul.mubr.bf16.vlgmr.msra.gmra.mrb[0].mxu0 %v387_v12  ;;  %v264_v13 = vmul.f32 30.0, %v262_v10 }
  0x94   :  { %v163_v16 = vpop.permute.xlu0 %162 }
  0x95   :  { %vm167_vm2 = vcmp.eq.s32.totalorder %v158_v15, %v163_v16 }
  0x96   :  { %vm172_vm4 = vmor %vm167_vm2, %vm169_vm3 }
  0x98   :  { %v166_v17 = vpop.permute.xlu0 %165 }
  0x99   :  { %vm168_vm5 = vcmp.eq.s32.totalorder %v158_v15, %v166_v17 }
  0x9a   :  { %vm173_vm6 = vmor %vm168_vm5, %vm169_vm3 }
 0x107   :  { %v147_v18 = vpop.f32.mrb[0].mxu0 }
 0x108   :  { %v174_v19 = vmul.f32 30.0, %v147_v18  ;;  %v362_v20 = vpop.f32.mrb[1].mxu0 }
 0x109   :  { %v150_v21 = vpop.f32.mrb[2].mxu0 }
 0x10a   :  { %v175_v22 = vmul.f32 30.0, %v150_v21  ;;  %v363_v23 = vpop.f32.mrb[3].mxu0  ;;  %v176_v24 = vsel %vm172_vm4, -1e+30, %v174_v19 }
 0x10b   :  { %180 = vmax.xlane.f32.xlu1 %v176_v24 }
 0x10c   :  { %v177_v25 = vsel %vm173_vm6, -1e+30, %v175_v22 }
 0x10f   :  { %182 = vmax.xlane.f32.xlu1 %v177_v25 }
 0x198   :  { %v181_v27 = vpop.xlane.xlu1 %180 }
 0x199   :  { %v508_v28 = vmax.f32 %v505_v26, %v181_v27  ;;  %v186_v27 = vld [vmem:[#allocation3] sm:$0xff] }
 0x19b   :  { %v188_v30 = vsub.f32 %v505_v26, %v508_v28  ;;  %221 = vst.msk [vmem:[#allocation2] sm:$0xff] %vm36_vm1, %v508_v28  ;;  %198 = vperm.xlu0 %372, %v508_v28  }
 0x19c   :  { %v183_v31 = vpop.xlane.xlu1 %182 }
 0x19d   :  { %v518_v32 = vmax.f32 %v510_v29, %v183_v31  ;;  %v190_v18 = vmul.f32 1.442695, %v188_v30 }
 0x19f   :  { %v189_v33 = vsub.f32 %v510_v29, %v518_v32  ;;  %222 = vst.msk [vmem:[#allocation2 + $0x8] sm:$0xff] %vm36_vm1, %v518_v32  ;;  %203 = vperm.xlu1 %373, %v518_v32   ;;  %v187_v29 = vld [vmem:[#allocation3 + $0x8] sm:$0xff] }
 0x1a1   :  { %v192_v19 = vmul.f32 1.442695, %v189_v33 }
 0x1a2   :  { %v266_v14 = vld [vmem:[#allocation2] sm:$0xff] }
 0x1a3   :  { %vm298_vm14 = vcmp.ge.f32.partialorder %v264_v13, %v266_v14  ;;  %v268_v20 = vmax.f32 %v266_v14, %v264_v13 }
 0x1a4   :  { %v333_v16 = vsel %vm298_vm14, 1.0, %v439_v0 }
 0x1a5   :  { %v272_v22 = vsub.f32 %v266_v14, %v268_v20  ;;  %v280_v23 = vsub.f32 %v264_v13, %v268_v20 }
 0x1a6   :  { %v267_v12 = vld [vmem:[#allocation2 + $0x8] sm:$0xff] }
 0x1a7   :  { %vm299_vm13 = vcmp.ge.f32.partialorder %v531_v11, %v267_v12  ;;  %v269_v21 = vmax.f32 %v267_v12, %v531_v11  ;;  %v282_v34 = vmul.f32 1.442695, %v280_v23 }
 0x1a8   :  { %v334_v15 = vsel %vm299_vm13, 1.0, %v439_v0 }
 0x1a9   :  { %v374_v17 = vpack.i.bf16 %v334_v15, %v333_v16  ;;  %v273_v0 = vsub.f32 %v267_v12, %v269_v21  ;;  %v281_v31 = vsub.f32 %v531_v11, %v269_v21 }
 0x1ab   :  { %v276_v30 = vmul.f32 1.442695, %v273_v0  ;;  %v284_v33 = vmul.f32 1.442695, %v281_v31 }
 0x21a   :  { %v199_v44 = vpop.permute.xlu0 %198 }
 0x21b   :  { %v206_v45 = vsub.f32 %v176_v24, %v199_v44 }
 0x21d   :  { %v208_v47 = vmul.f32 1.442695, %v206_v45 }
 0x21e   :  { %v204_v49 = vpop.permute.xlu1 %203 }
 0x21f   :  { %392 = vpow2.f32 %v208_v47  ;;  %v207_v50 = vsub.f32 %v177_v25, %v204_v49  ;;  %v274_v25 = vmul.f32 1.442695, %v272_v22 }
 0x221   :  { %v210_v52 = vmul.f32 1.442695, %v207_v50 }
 0x223   :  { %394 = vpow2.f32 %v210_v52 }
 0x224   :  { %396 = vpow2.f32 %v190_v18 }
 0x225   :  { %398 = vpow2.f32 %v192_v19 }
 0x226   :  { %400 = vpow2.f32 %v274_v25 }
 0x227   :  { %402 = vpow2.f32 %v282_v34 }
 0x228   :  { %404 = vpow2.f32 %v276_v30 }
 0x229   :  { %v393_v60 = vpop.eup %392  ;;  %406 = vpow2.f32 %v284_v33 }
 0x22a   :  { %212 = vadd.xlane.f32.xlu0 %v393_v60 }
 0x22d   :  { %v395_v4 = vpop.eup %394 }
 0x22e   :  { %214 = vadd.xlane.f32.xlu1 %v395_v4  ;;  %v397_v24 = vpop.eup %396 }
 0x22f   :  { %v194_v26 = vmul.f32 %v397_v24, %v186_v27  ;;  %v399_v28 = vpop.eup %398 }
 0x230   :  { %v195_v36 = vmul.f32 %v399_v28, %v187_v29  ;;  %v401_v39 = vpop.eup %400 }
 0x231   :  { %v403_v42 = vpop.eup %402 }
 0x232   :  { %v405_v44 = vpop.eup %404 }
 0x233   :  { %v407_v47 = vpop.eup %406 }
 0x240   :  { %375 = vrot.lane.b32.xlu0 %v374_v17, %s443_s3 }
 0x2b7   :  { %v213_v35 = vpop.xlane.xlu0 %212 }
 0x2b8   :  { %v216_v32 = vadd.f32 %v213_v35, %v194_v26 }
 0x2ba   :  { %219 = vst.msk [vmem:[#allocation3] sm:$0xff] %vm36_vm1, %v216_v32 }
 0x2bb   :  { %v215_v37 = vpop.xlane.xlu1 %214  ;;  %v376_v51 = vpop.permute.xlu0 %375 }
 0x2bc   :  { %v217_v38 = vadd.f32 %v215_v37, %v195_v36  ;;  %v377_v56 = vunpack.i.l.bf16 %v376_v51  ;;  %v378_v59 = vunpack.i.h.bf16 %v376_v51 }
 0x2be   :  { %220 = vst.msk [vmem:[#allocation3 + $0x8] sm:$0xff] %vm36_vm1, %v217_v38 }
 0x2c1   :  { %v270_v40 = vld [vmem:[#allocation3] sm:$0xff] }
 0x2c2   :  { %v278_v41 = vmul.f32 %v401_v39, %v270_v40 }
 0x2c4   :  { %v286_v43 = vadd.f32 %v403_v42, %v278_v41 }
 0x2c5   :  { %v271_v45 = vld [vmem:[#allocation3 + $0x8] sm:$0xff] }
 0x2c6   :  { %v279_v46 = vmul.f32 %v405_v44, %v271_v45  ;;  %408 = vlog2.f32 %v286_v43 }
 0x2c8   :  { %v287_v48 = vadd.f32 %v407_v47, %v279_v46 }
 0x2ca   :  { %410 = vlog2.f32 %v287_v48 }
 0x2d0   :  { %v409_v49 = vpop.eup %408 }
 0x2d1   :  { %v289_v50 = vmul.f32 0.6931472, %v409_v49 }
 0x2d3   :  { %v292_v52 = vadd.f32 %v289_v50, %v268_v20 }
 0x2d4   :  { %v411_v53 = vpop.eup %410 }
 0x2d5   :  { %v291_v54 = vmul.f32 0.6931472, %v411_v53  ;;  %v294_v55 = vsub.f32 %v292_v52, %v264_v13 }
 0x2d7   :  { %v293_v57 = vadd.f32 %v291_v54, %v269_v21  ;;  %296 = vst.msk [vmem:[%s565_s4] sm:$0xff] %vm36_vm1, %v294_v55 }
 0x2d8   :  { %313 = vst.msk [vmem:[%s565_s4] sm:$0xff] %vm312_vm15, %v377_v56 }
 0x2d9   :  { %v295_v58 = vsub.f32 %v293_v57, %v531_v11 }
 0x2db   :  { %297 = vst.msk [vmem:[%s565_s4 + $0x8] sm:$0xff] %vm36_vm1, %v295_v58 }
 0x2dc   :  { %314 = vst.msk [vmem:[%s565_s4 + $0x8] sm:$0xff] %vm312_vm15, %v378_v59 }
 0x2dd   :  { %319 = vsyncpa [#allocation5], 1 }

</bundles_post_ra>
